<compile_context>
chip_gen: v5e
topology: v5e:2x2
jax: 0.10.0
libtpu: 0.0.40
codegen_flags: <defaults>
</compile_context>

<pallas_src>
import functools
import math

import jax
import jax.numpy as jnp
from jax.experimental import pallas as pl
from jax.experimental.pallas import tpu as pltpu

EMBED_DIM = 128
HIDDEN = EMBED_DIM * 2          # 256
OUT_DIM = 28 * 28               # 784
OUT_PAD = 896                   # 7 * 128 -> lane-dense padding of 784
MVPE = 2000.0
MAX_POS = 10000.0 * MVPE


def _round_up(n, m):
    return ((n + m - 1) // m) * m


def _embed_constants():
    """Hoisted embed_number constants: scaled frequencies + parity phase."""
    i = jnp.arange(EMBED_DIM, dtype=jnp.float32)
    k = jnp.floor(i * 0.5)
    wk = jnp.exp(math.log(MAX_POS) * (-(2.0 * k) / EMBED_DIM)) * MVPE     # (128,)
    # PyTorch reference keeps sin on even i, cos on odd i; cos(x) = sin(x + pi/2).
    phase = (jnp.arange(EMBED_DIM) % 2).astype(jnp.float32) * (math.pi / 2.0)
    return wk.reshape(1, EMBED_DIM), phase.reshape(1, EMBED_DIM)


def net_kernel(x_ref, noise_ref, wk_ref, ph_ref, w1_ref, b1_ref, w2_ref, b2_ref,
               out_ref):
    # ---- embed_number(x, 128): single-sin form --------------------------------
    number = x_ref[...]                                  # (bb, 1) f32
    emb = jnp.sin(number * wk_ref[...] + ph_ref[...])    # sin even / cos odd lanes

    # ---- x = x + randn_like(x): noise streamed in ------------------------------
    h = emb + noise_ref[...]                             # (bb, 128) f32

    # ---- Linear(128, 256) + ReLU  (bf16 MXU, f32 accumulation) -----------------
    h = jnp.dot(h.astype(jnp.bfloat16), w1_ref[...],
                preferred_element_type=jnp.float32) + b1_ref[...]
    h = jnp.maximum(h, 0.0)

    # ---- Linear(256, 784 -> 896 padded) + Tanh ---------------------------------
    o = jnp.dot(h.astype(jnp.bfloat16), w2_ref[...],
                preferred_element_type=jnp.float32) + b2_ref[...]
    out_ref[...] = jnp.tanh(o)


@functools.partial(jax.jit, static_argnames=("block_b",))
def net_forward(x, key, w1, b1, w2, b2, *, block_b=512):
    """x: (B, 1) f32, key: PRNG key for the additive noise -> (B, 1, 28, 28) f32."""
    B = x.shape[0]
    # Noise is tied to (B, 128) before any padding/tiling -> reproducible.
    noise = jax.random.normal(key, (B, EMBED_DIM), jnp.float32)

    # --- batch tile selection ---------------------------------------------------
    Bp0 = _round_up(B, 8)
    bb = min(block_b, Bp0)
    if Bp0 >= 16 and bb >= Bp0:
        bb = Bp0 // 2            # keep >= 2 grid steps so "parallel" shards (v7x)
    bb = max(8, _round_up(bb, 8))
    Bp = _round_up(B, bb)

    if Bp != B:
        x = jnp.pad(x, ((0, Bp - B), (0, 0)))
        noise = jnp.pad(noise, ((0, Bp - B), (0, 0)))

    # Lane-pad the second linear layer 784 -> 896 (7*128); bf16 weights for MXU.
    w2p = jnp.pad(w2, ((0, 0), (0, OUT_PAD - OUT_DIM)))
    b2p = jnp.pad(b2, ((0, 0), (0, OUT_PAD - OUT_DIM)))
    w1b = w1.astype(jnp.bfloat16)
    w2b = w2p.astype(jnp.bfloat16)

    wk, phase = _embed_constants()

    const = lambda shape: pl.BlockSpec(shape, lambda i: (0, 0))

    cost = pl.CostEstimate(
        flops=2 * Bp * (EMBED_DIM * HIDDEN + HIDDEN * OUT_PAD),
        transcendentals=Bp * (EMBED_DIM + OUT_PAD),
        bytes_accessed=(2 * (EMBED_DIM * HIDDEN + HIDDEN * OUT_PAD)     # bf16 weights
                        + 4 * (HIDDEN + OUT_PAD + 2 * EMBED_DIM)        # biases/consts
                        + 4 * Bp * (1 + EMBED_DIM + OUT_PAD)),          # x, noise, out
    )

    out = pl.pallas_call(
        net_kernel,
        out_shape=jax.ShapeDtypeStruct((Bp, OUT_PAD), jnp.float32),
        grid_spec=pltpu.PrefetchScalarGridSpec(
            num_scalar_prefetch=0,
            grid=(Bp // bb,),
            in_specs=[
                pl.BlockSpec((bb, 1), lambda i: (i, 0)),          # x (batch-tiled)
                pl.BlockSpec((bb, EMBED_DIM), lambda i: (i, 0)),  # noise (batch-tiled)
                const((1, EMBED_DIM)),                            # wk * MVPE
                const((1, EMBED_DIM)),                            # parity phase
                const((EMBED_DIM, HIDDEN)),                       # W1 (in x out, bf16)
                const((1, HIDDEN)),                               # b1
                const((HIDDEN, OUT_PAD)),                         # W2 (padded, bf16)
                const((1, OUT_PAD)),                              # b2 (padded)
            ],
            out_specs=pl.BlockSpec((bb, OUT_PAD), lambda i: (i, 0)),
        ),
        compiler_params=pltpu.CompilerParams(
            dimension_semantics=("parallel",)),
        cost_estimate=cost,
    )(x, noise, wk, phase, w1b, b1, w2b, b2p)

    return out[:B, :OUT_DIM].reshape(B, 1, 28, 28)


def net_reference(x, key, w1, b1, w2, b2):
    """Pure-JAX f32 reference replicating the PyTorch forward (rgba=False)."""
    B = x.shape[0]
    noise = jax.random.normal(key, (B, EMBED_DIM), jnp.float32)
    i = jnp.arange(EMBED_DIM, dtype=jnp.float32)
    k = jnp.floor(i * 0.5)
    wk = jnp.exp(math.log(MAX_POS) * (-(2.0 * k) / EMBED_DIM))
    radians = wk * x * MVPE                                   # (B, 128)
    even = (jnp.arange(EMBED_DIM) % 2) == 0
    emb = jnp.where(even, jnp.sin(radians), jnp.cos(radians))
    h = emb + noise
    h = jnp.maximum(h @ w1 + b1, 0.0)
    o = jnp.tanh(h @ w2 + b2)
    return o.reshape(B, 1, 28, 28)


def init_params(key):
    """Parameter init mimicking nn.Linear shapes.

    PyTorch Linear stores weight as (out, in); we store the transpose (in, out)
    so the kernel does y = x @ W + b.
    """
    k1, k2, k3, k4 = jax.random.split(key, 4)
    s1 = 1.0 / math.sqrt(EMBED_DIM)
    s2 = 1.0 / math.sqrt(HIDDEN)
    w1 = jax.random.uniform(k1, (EMBED_DIM, HIDDEN), jnp.float32, -s1, s1)
    b1 = jax.random.uniform(k2, (1, HIDDEN), jnp.float32, -s1, s1)
    w2 = jax.random.uniform(k3, (HIDDEN, OUT_DIM), jnp.float32, -s2, s2)
    b2 = jax.random.uniform(k4, (1, OUT_DIM), jnp.float32, -s2, s2)
    return w1, b1, w2, b2


if __name__ == "__main__":
    key = jax.random.PRNGKey(0)
    k_params, k_x, k_noise = jax.random.split(key, 3)

    B = 8
    # Input "numbers" (e.g. digits 0..9 as floats), shaped (B, 1) like the
    # unsqueeze(-1) inside embed_number.
    x = jax.random.uniform(k_x, (B, 1), jnp.float32, 0.0, 9.0)

    w1, b1, w2, b2 = init_params(k_params)

    out = jax.block_until_ready(net_forward(x, k_noise, w1, b1, w2, b2))

    assert out.shape == (B, 1, 28, 28), out.shape
    assert out.dtype == jnp.float32
    assert bool(jnp.all(jnp.isfinite(out)))
    assert bool(jnp.all(jnp.abs(out) <= 1.0))  # tanh output range

    # Loose tolerance: kernel uses bf16 MXU matmuls (f32 accumulation) vs f32 ref.
    ref = net_reference(x, k_noise, w1, b1, w2, b2)
    max_err = float(jnp.max(jnp.abs(out - ref)))
    assert max_err < 0.15, f"max abs diff vs reference: {max_err}"

    print("KERNEL_OK")
</pallas_src>

<mosaic_0001>
module attributes {stable_mosaic.version = 11 : i64} {
  func.func @net_kernel(%arg0: i32, %arg1: memref<8x1xf32, #tpu.memory_space<vmem>>, %arg2: memref<8x128xf32, #tpu.memory_space<vmem>>, %arg3: memref<1x128xf32, #tpu.memory_space<vmem>>, %arg4: memref<1x128xf32, #tpu.memory_space<vmem>>, %arg5: memref<128x256xbf16, #tpu.memory_space<vmem>>, %arg6: memref<1x256xf32, #tpu.memory_space<vmem>>, %arg7: memref<256x896xbf16, #tpu.memory_space<vmem>>, %arg8: memref<1x896xf32, #tpu.memory_space<vmem>>, %arg9: memref<8x896xf32, #tpu.memory_space<vmem>>) attributes {dimension_semantics = [#tpu.dimension_semantics<parallel>], iteration_bounds = array<i64: 1>, scalar_prefetch = 0 : i64, scratch_operands = 0 : i64, tpu.core_type = #tpu.core_type<tc>, window_params = [{transform_indices = @transform_0, window_bounds = array<i64: 8, 1>}, {transform_indices = @transform_1, window_bounds = array<i64: 8, 128>}, {pipeline_mode = #tpu.pipeline_mode<synchronous>, transform_indices = @transform_2, window_bounds = array<i64: 1, 128>}, {pipeline_mode = #tpu.pipeline_mode<synchronous>, transform_indices = @transform_3, window_bounds = array<i64: 1, 128>}, {pipeline_mode = #tpu.pipeline_mode<synchronous>, transform_indices = @transform_4, window_bounds = array<i64: 128, 256>}, {pipeline_mode = #tpu.pipeline_mode<synchronous>, transform_indices = @transform_5, window_bounds = array<i64: 1, 256>}, {pipeline_mode = #tpu.pipeline_mode<synchronous>, transform_indices = @transform_6, window_bounds = array<i64: 256, 896>}, {pipeline_mode = #tpu.pipeline_mode<synchronous>, transform_indices = @transform_7, window_bounds = array<i64: 1, 896>}, {transform_indices = @transform_8, window_bounds = array<i64: 8, 896>}]} {
    %c0 = arith.constant 0 : index
    %c0_0 = arith.constant 0 : index
    %0 = vector.load %arg1[%c0, %c0_0] : memref<8x1xf32, #tpu.memory_space<vmem>>, vector<8x1xf32>
    %c0_1 = arith.constant 0 : index
    %c0_2 = arith.constant 0 : index
    %1 = vector.load %arg3[%c0_1, %c0_2] : memref<1x128xf32, #tpu.memory_space<vmem>>, vector<1x128xf32>
    %2 = vector.broadcast %0 : vector<8x1xf32> to vector<8x128xf32>
    %3 = vector.broadcast %1 : vector<1x128xf32> to vector<8x128xf32>
    %4 = arith.mulf %2, %3 : vector<8x128xf32>
    %c0_3 = arith.constant 0 : index
    %c0_4 = arith.constant 0 : index
    %5 = vector.load %arg4[%c0_3, %c0_4] : memref<1x128xf32, #tpu.memory_space<vmem>>, vector<1x128xf32>
    %6 = vector.broadcast %5 : vector<1x128xf32> to vector<8x128xf32>
    %7 = arith.addf %4, %6 : vector<8x128xf32>
    %8 = math.sin %7 : vector<8x128xf32>
    %c0_5 = arith.constant 0 : index
    %c0_6 = arith.constant 0 : index
    %9 = vector.load %arg2[%c0_5, %c0_6] : memref<8x128xf32, #tpu.memory_space<vmem>>, vector<8x128xf32>
    %10 = arith.addf %8, %9 : vector<8x128xf32>
    %11 = arith.truncf %10 : vector<8x128xf32> to vector<8x128xbf16>
    %c0_7 = arith.constant 0 : index
    %c0_8 = arith.constant 0 : index
    %12 = vector.load %arg5[%c0_7, %c0_8] : memref<128x256xbf16, #tpu.memory_space<vmem>>, vector<128x256xbf16>
    %cst = arith.constant dense<0.000000e+00> : vector<8x256xf32>
    %13 = tpu.matmul %11, %12, %cst {dimension_numbers = #tpu.dot_dimension_numbers<[1], [0], [0], [1], [0, 0, 1, 1], [], []>} : vector<8x128xbf16>, vector<128x256xbf16>, vector<8x256xf32> -> vector<8x256xf32>
    %c0_9 = arith.constant 0 : index
    %c0_10 = arith.constant 0 : index
    %14 = vector.load %arg6[%c0_9, %c0_10] : memref<1x256xf32, #tpu.memory_space<vmem>>, vector<1x256xf32>
    %15 = vector.broadcast %14 : vector<1x256xf32> to vector<8x256xf32>
    %16 = arith.addf %13, %15 : vector<8x256xf32>
    %cst_11 = arith.constant 0.000000e+00 : f32
    %17 = vector.broadcast %cst_11 : f32 to vector<8x256xf32>
    %18 = arith.maximumf %16, %17 : vector<8x256xf32>
    %19 = arith.truncf %18 : vector<8x256xf32> to vector<8x256xbf16>
    %c0_12 = arith.constant 0 : index
    %c0_13 = arith.constant 0 : index
    %20 = vector.load %arg7[%c0_12, %c0_13] : memref<256x896xbf16, #tpu.memory_space<vmem>>, vector<256x896xbf16>
    %cst_14 = arith.constant dense<0.000000e+00> : vector<8x896xf32>
    %21 = tpu.matmul %19, %20, %cst_14 {dimension_numbers = #tpu.dot_dimension_numbers<[1], [0], [0], [1], [0, 0, 1, 1], [], []>} : vector<8x256xbf16>, vector<256x896xbf16>, vector<8x896xf32> -> vector<8x896xf32>
    %c0_15 = arith.constant 0 : index
    %c0_16 = arith.constant 0 : index
    %22 = vector.load %arg8[%c0_15, %c0_16] : memref<1x896xf32, #tpu.memory_space<vmem>>, vector<1x896xf32>
    %23 = vector.broadcast %22 : vector<1x896xf32> to vector<8x896xf32>
    %24 = arith.addf %21, %23 : vector<8x896xf32>
    %25 = math.tanh %24 : vector<8x896xf32>
    %c0_17 = arith.constant 0 : index
    %c0_18 = arith.constant 0 : index
    %26 = vector.load %arg9[%c0_17, %c0_18] : memref<8x896xf32, #tpu.memory_space<vmem>>, vector<8x896xf32>
    tpu.vector_store %arg9[%c0_17, %c0_18], %25 {strides = array<i32>} : memref<8x896xf32, #tpu.memory_space<vmem>>, vector<8x896xf32>,
    return
  }
  func.func @transform_0(%arg0: i32) -> (i32, i32) {
    %c0_i32 = arith.constant 0 : i32
    %c0_i32_0 = arith.constant 0 : i32
    return %arg0, %c0_i32 : i32, i32
  }
  func.func @transform_1(%arg0: i32) -> (i32, i32) {
    %c0_i32 = arith.constant 0 : i32
    %c0_i32_0 = arith.constant 0 : i32
    return %arg0, %c0_i32 : i32, i32
  }
  func.func @transform_2(%arg0: i32) -> (i32, i32) {
    %c0_i32 = arith.constant 0 : i32
    %c0_i32_0 = arith.constant 0 : i32
    %c0_i32_1 = arith.constant 0 : i32
    return %c0_i32, %c0_i32_0 : i32, i32
  }
  func.func @transform_3(%arg0: i32) -> (i32, i32) {
    %c0_i32 = arith.constant 0 : i32
    %c0_i32_0 = arith.constant 0 : i32
    %c0_i32_1 = arith.constant 0 : i32
    return %c0_i32, %c0_i32_0 : i32, i32
  }
  func.func @transform_4(%arg0: i32) -> (i32, i32) {
    %c0_i32 = arith.constant 0 : i32
    %c0_i32_0 = arith.constant 0 : i32
    %c0_i32_1 = arith.constant 0 : i32
    return %c0_i32, %c0_i32_0 : i32, i32
  }
  func.func @transform_5(%arg0: i32) -> (i32, i32) {
    %c0_i32 = arith.constant 0 : i32
    %c0_i32_0 = arith.constant 0 : i32
    %c0_i32_1 = arith.constant 0 : i32
    return %c0_i32, %c0_i32_0 : i32, i32
  }
  func.func @transform_6(%arg0: i32) -> (i32, i32) {
    %c0_i32 = arith.constant 0 : i32
    %c0_i32_0 = arith.constant 0 : i32
    %c0_i32_1 = arith.constant 0 : i32
    return %c0_i32, %c0_i32_0 : i32, i32
  }
  func.func @transform_7(%arg0: i32) -> (i32, i32) {
    %c0_i32 = arith.constant 0 : i32
    %c0_i32_0 = arith.constant 0 : i32
    %c0_i32_1 = arith.constant 0 : i32
    return %c0_i32, %c0_i32_0 : i32, i32
  }
  func.func @transform_8(%arg0: i32) -> (i32, i32) {
    %c0_i32 = arith.constant 0 : i32
    %c0_i32_0 = arith.constant 0 : i32
    return %arg0, %c0_i32 : i32, i32
  }
}

</mosaic_0001>

<bundles_post_ra>
// kernel: net_forward.1
= control target key start
LH: loop header
LB: loop body
LE: loop exit
PB: predicated region body
PF: predicated region fallthrough
CT: control target
= control target key end

     0   :  { %v1922_v0 = vmov 0   ;;  %s2888_s0 = inlined_call_operand.vmem [shape: f32[8,1], index: 0, kind: input, shape index: {}]   ;;  %s2889_s2 = inlined_call_operand.vmem [shape: f32[1,128], index: 2, kind: input, shape index: {}]   ;;  %s2890_s3 = inlined_call_operand.vmem [shape: f32[1,128], index: 3, kind: input, shape index: {}]   ;;  %s2891_s4 = inlined_call_operand.vmem [shape: bf16[128,256], index: 4, kind: input, shape index: {}]   ;;  %s2892_s6 = inlined_call_operand.vmem [shape: bf16[256,896], index: 6, kind: input, shape index: {}]   ;;  %s2893_s1 = inlined_call_operand.vmem [shape: f32[8,128], index: 1, kind: input, shape index: {}]   ;;  %s2894_s5 = inlined_call_operand.vmem [shape: f32[1,256], index: 5, kind: input, shape index: {}]   ;;  %s2895_s7 = inlined_call_operand.vmem [shape: f32[1,896], index: 7, kind: input, shape index: {}]   ;;  %s2896_s8 = inlined_call_operand.vmem [shape: f32[8,896], index: 8, kind: output, shape index: {}]  }
   0x1   :  { %1905 = vset.pattern.permute.xlu0 %v1922_v0  ;;  %v29_v1 = vld [vmem:[%s2888_s0] sm:$0xff]  ;;  %v1316_v2 = vld [vmem:[%s2891_s4 + $0x70] sm:$0xf]  ;;  %v1785_v3 = vld [vmem:[%s2891_s4 + $0x74] sm:$0xf0] }
   0x2   :  { %33 = vperm.xlu0 %1905, %v29_v1   ;;  %v1784_v4 = vld [vmem:[%s2891_s4 + $0x74] sm:$0xf]  ;;  %v1317_v5 = vor.u32 %v1785_v3, %v1316_v2  ;;  %v1318_v6 = vld [vmem:[%s2891_s4 + $0x78] sm:$0xf0]  ;;  %v1308_v7 = vld [vmem:[%s2891_s4 + $0x60] sm:$0xf] }
   0x3   :  { %v1783_v8 = vld [vmem:[%s2891_s4 + $0x64] sm:$0xf0]  ;;  %v1321_v9 = vor.u32 %v1784_v4, %v1318_v6  ;;  %v1782_v10 = vld [vmem:[%s2891_s4 + $0x64] sm:$0xf]  ;;  %v1310_v11 = vld [vmem:[%s2891_s4 + $0x68] sm:$0xf0] }
   0x4   :  { %305 = vmatpush.bf16.msra.mxu0 %v1317_v5  ;;  %v1309_v12 = vor.u32 %v1783_v8, %v1308_v7  ;;  %v1313_v13 = vor.u32 %v1782_v10, %v1310_v11  ;;  %v1300_v14 = vld [vmem:[%s2891_s4 + $0x50] sm:$0xf]  ;;  %v1781_v15 = vld [vmem:[%s2891_s4 + $0x54] sm:$0xf0]  ;;  %v1780_v16 = vld [vmem:[%s2891_s4 + $0x54] sm:$0xf] }
   0x5   :  { %318 = vmatpush.bf16.msra.mxu1 %v1321_v9  ;;  %v1302_v17 = vld [vmem:[%s2891_s4 + $0x58] sm:$0xf0]  ;;  %v1906_v18 = vld [vmem:[%s2889_s2] ss:$0 sm:$0xff]  ;;  %v1301_v19 = vor.u32 %v1781_v15, %v1300_v14  ;;  %v1779_v23 = vld [vmem:[%s2891_s4 + $0x44] sm:$0xf0] }
   0x6   :  { %v1907_v20 = vld [vmem:[%s2890_s3] ss:$0 sm:$0xff]  ;;  %v1305_v21 = vor.u32 %v1780_v16, %v1302_v17  ;;  %v1778_v25 = vld [vmem:[%s2891_s4 + $0x44] sm:$0xf]  ;;  %v1294_v26 = vld [vmem:[%s2891_s4 + $0x48] sm:$0xf0] }
   0x7   :  { %v1292_v22 = vld [vmem:[%s2891_s4 + $0x40] sm:$0xf]  ;;  %v1297_v30 = vor.u32 %v1778_v25, %v1294_v26  ;;  %v1284_v31 = vld [vmem:[%s2891_s4 + $0x30] sm:$0xf]  ;;  %v1777_v32 = vld [vmem:[%s2891_s4 + $0x34] sm:$0xf0] }
   0x8   :  { %306 = vmatpush.bf16.msra.mxu0 %v1309_v12  ;;  %v1293_v28 = vor.u32 %v1779_v23, %v1292_v22  ;;  %v1776_v33 = vld [vmem:[%s2891_s4 + $0x34] sm:$0xf]  ;;  %v1286_v34 = vld [vmem:[%s2891_s4 + $0x38] sm:$0xf0]  ;;  %v1285_v36 = vor.u32 %v1777_v32, %v1284_v31  ;;  %v1276_v39 = vld [vmem:[%s2891_s4 + $0x20] sm:$0xf] }
   0x9   :  { %319 = vmatpush.bf16.msra.mxu1 %v1313_v13  ;;  %v1289_v38 = vor.u32 %v1776_v33, %v1286_v34  ;;  %v1775_v40 = vld [vmem:[%s2891_s4 + $0x24] sm:$0xf0]  ;;  %v1774_v41 = vld [vmem:[%s2891_s4 + $0x24] sm:$0xf]  ;;  %v1278_v42 = vld [vmem:[%s2891_s4 + $0x28] sm:$0xf0] }
   0xa   :  { %v1277_v45 = vor.u32 %v1775_v40, %v1276_v39  ;;  %v1281_v47 = vor.u32 %v1774_v41, %v1278_v42  ;;  %v1268_v48 = vld [vmem:[%s2891_s4 + $0x10] sm:$0xf]  ;;  %v1773_v49 = vld [vmem:[%s2891_s4 + $0x14] sm:$0xf0]  ;;  %v1772_v50 = vld [vmem:[%s2891_s4 + $0x14] sm:$0xf] }
   0xb   :  { %v1270_v51 = vld [vmem:[%s2891_s4 + $0x18] sm:$0xf0]  ;;  %v1269_v54 = vor.u32 %v1773_v49, %v1268_v48  ;;  %v1260_v55 = vld [vmem:[%s2891_s4] sm:$0xf]  ;;  %v1771_v56 = vld [vmem:[%s2891_s4 + $0x4] sm:$0xf0] }
   0xc   :  { %307 = vmatpush.bf16.msra.mxu0 %v1301_v19  ;;  %v1273_v58 = vor.u32 %v1772_v50, %v1270_v51  ;;  %v1770_v59 = vld [vmem:[%s2891_s4 + $0x4] sm:$0xf]  ;;  %v1262_v60 = vld [vmem:[%s2891_s4 + $0x8] sm:$0xf0]  ;;  %v1261_v62 = vor.u32 %v1771_v56, %v1260_v55  ;;  %v1923_v2 = vmov 2102212464  }
   0xd   :  { %320 = vmatpush.bf16.msra.mxu1 %v1305_v21  ;;  %v1924_v4 = vmov 920167782   ;;  %v1265_v6 = vor.u32 %v1770_v59, %v1262_v60  ;;  %v1925_v8 = vmov 1326507024   ;;  %v1926_v10 = vmov 683565275  }
   0xe   :  { %v1927_v12 = vmov 2475754826   ;;  %v1928_v15 = vmov 2131351028  }
  0x10   :  { %308 = vmatpush.bf16.msra.mxu0 %v1293_v28 }
  0x11   :  { %321 = vmatpush.bf16.msra.mxu1 %v1297_v30 }
  0x14   :  { %309 = vmatpush.bf16.msra.mxu0 %v1285_v36 }
  0x15   :  { %322 = vmatpush.bf16.msra.mxu1 %v1289_v38 }
  0x18   :  { %310 = vmatpush.bf16.msra.mxu0 %v1277_v45 }
  0x19   :  { %323 = vmatpush.bf16.msra.mxu1 %v1281_v47 }
  0x1c   :  { %311 = vmatpush.bf16.msra.mxu0 %v1269_v54 }
  0x1d   :  { %324 = vmatpush.bf16.msra.mxu1 %v1273_v58 }
  0x20   :  { %312 = vmatpush.bf16.msra.mxu0 %v1261_v62 }
  0x21   :  { %325 = vmatpush.bf16.msra.mxu1 %v1265_v6 }
  0x74   :  { %v34_v24 = vpop.permute.xlu0 %33 }
  0x75   :  { %v39_v27 = vmul.f32 %v1906_v18, %v34_v24 }
  0x77   :  { %v2032_v29 = vadd.f32 %v1907_v20, %v39_v27 }
  0x79   :  { %v48_v35 = vand.u32 2139095040, %v2032_v29  ;;  %v45_v44 = vand.u32 2147483647, %v2032_v29  ;;  %vm47_vm12 = vcmp.lt.s32.totalorder %v2032_v29, 0 }
  0x7b   :  { %v49_v37 = vshrl.u32 %v48_v35, 23  ;;  %v52_v52 = vand.u32 8388607, %v45_v44  ;;  %vm2138_vm13 = vcmp.le.f32.partialorder %v45_v44, 0.7853982 }
  0x7c   :  { %v1744_v44 = vld [vmem:[%s2892_s6 + $0x348] sm:$0xf] }
  0x7d   :  { %v1255_v43 = vadd.s32 4294967169, %v49_v37  ;;  %v53_v63 = vor.u32 8388608, %v52_v52 }
  0x7f   :  { %v55_v46 = vadd.s32 1, %v1255_v43  ;;  %v2095_v22 = vshll.u32 %v53_v63, 8 }
  0x81   :  { %vm56_vm0 = vcmp.gt.s32.totalorder %v55_v46, 0  ;;  %v94_v33 = vand.u32 65535, %v2095_v22  ;;  %v95_v35 = vshrl.u32 %v2095_v22, 16 }
  0x82   :  { %v57_v53 = vsel %vm56_vm0, %v55_v46, 0 }
  0x83   :  { %v59_v57 = vand.u32 31, %v57_v53  ;;  %v2088_v1 = vshrl.u32 %v57_v53, 5 }
  0x85   :  { %v2086_v61 = vsub.s32 32, %v59_v57  ;;  %v71_v3 = vshll.u32 %v1923_v2, %v59_v57  ;;  %v74_v5 = vshll.u32 %v1924_v4, %v59_v57  ;;  %v62_v11 = vshll.u32 %v1926_v10, %v59_v57 }
  0x86   :  { %v65_v14 = vshll.u32 %v1927_v12, %v59_v57  ;;  %v68_v17 = vshll.u32 %v1928_v15, %v59_v57  ;;  %vm80_vm1 = vcmp.lt.s32.totalorder %v2088_v1, 4  ;;  %vm77_vm2 = vcmp.lt.s32.totalorder %v2088_v1, 1 }
  0x87   :  { %v72_v7 = vshrl.u32 %v1924_v4, %v2086_v61  ;;  %v75_v9 = vshrl.u32 %v1925_v8, %v2086_v61  ;;  %v63_v13 = vshrl.u32 %v1927_v12, %v2086_v61  ;;  %v66_v16 = vshrl.u32 %v1928_v15, %v2086_v61 }
  0x88   :  { %v69_v18 = vshrl.u32 %v1923_v2, %v2086_v61  ;;  %vm79_vm3 = vcmp.lt.s32.totalorder %v2088_v1, 3  ;;  %vm78_vm4 = vcmp.lt.s32.totalorder %v2088_v1, 2  ;;  %v61_v59 = vshrl.u32 %v1926_v10, %v2086_v61 }
  0x89   :  { %v73_v19 = vor.u32 %v72_v7, %v71_v3  ;;  %v76_v20 = vor.u32 %v75_v9, %v74_v5  ;;  %v64_v21 = vor.u32 %v63_v13, %v62_v11  ;;  %v67_v23 = vor.u32 %v66_v16, %v65_v14 }
  0x8a   :  { %v70_v24 = vor.u32 %v69_v18, %v68_v17 }
  0x8b   :  { %v86_v25 = vsel %vm80_vm1, %v73_v19, 920167782  ;;  %v90_v26 = vsel %vm80_vm1, %v76_v20, 1326507024  ;;  %v85_v27 = vsel %vm77_vm2, %v64_v21, %v67_v23  ;;  %v81_v4 = vsel %vm77_vm2, %v61_v59, %v64_v21  ;;  %v1716_v59 = vld [vmem:[%s2892_s6 + $0x310] sm:$0xf] }
  0x8c   :  { %v87_v28 = vsel %vm79_vm3, %v70_v24, %v86_v25  ;;  %v89_v30 = vsel %vm77_vm2, %v67_v23, %v70_v24  ;;  %v91_v32 = vsel %vm79_vm3, %v73_v19, %v90_v26  ;;  %v82_v56 = vsel %vm80_vm1, %v70_v24, 2102212464 }
  0x8d   :  { %v88_v31 = vsel %vm78_vm4, %v85_v27, %v87_v28  ;;  %v92_v34 = vsel %vm78_vm4, %v89_v30, %v91_v32  ;;  %v83_v5 = vsel %vm79_vm3, %v67_v23, %v82_v56  ;;  %vm188_vm1 = vweird.f32 %v2032_v29 }
  0x8e   :  { %v118_v36 = vand.u32 65535, %v88_v31  ;;  %v119_v37 = vshrl.u32 %v88_v31, 16  ;;  %v96_v38 = vand.u32 65535, %v92_v34  ;;  %v97_v39 = vshrl.u32 %v92_v34, 16 }
  0x8f   :  { %v84_v10 = vsel %vm78_vm4, %v81_v4, %v83_v5 }
  0x90   :  { %v121_v40 = vmul.u32 %v119_v37, %v94_v33  ;;  %v122_v41 = vmul.u32 %v118_v36, %v95_v35  ;;  %v99_v42 = vmul.u32 %v97_v39, %v94_v33  ;;  %v100_v43 = vmul.u32 %v96_v38, %v95_v35 }
  0x91   :  { %v120_v45 = vmul.u32 %v118_v36, %v94_v33  ;;  %v98_v47 = vmul.u32 %v96_v38, %v94_v33  ;;  %v123_v49 = vmul.u32 %v119_v37, %v95_v35  ;;  %v101_v50 = vmul.u32 %v97_v39, %v95_v35 }
  0x92   :  { %v124_v46 = vshll.u32 %v121_v40, 16  ;;  %v102_v48 = vshll.u32 %v99_v42, 16  ;;  %v126_v51 = vshll.u32 %v122_v41, 16  ;;  %v104_v53 = vshll.u32 %v100_v43, 16 }
  0x93   :  { %v125_v2 = vshrl.u32 %v121_v40, 16  ;;  %v103_v6 = vshrl.u32 %v99_v42, 16  ;;  %v127_v8 = vshrl.u32 %v122_v41, 16  ;;  %v105_v11 = vshrl.u32 %v100_v43, 16  ;;  %v1520_v42 = vld [vmem:[%s2892_s6 + $0x188] sm:$0xf] }
  0x94   :  { %vm128_vm5 = vc.u32 %v120_v45, %v124_v46  ;;  %v130_v52 = vadd.s32 %v124_v46, %v120_v45  ;;  %vm106_vm6 = vc.u32 %v98_v47, %v102_v48  ;;  %v108_v54 = vadd.s32 %v102_v48, %v98_v47  ;;  %v1838_v43 = vld [vmem:[%s2892_s6 + $0x1a0] sm:$0xf0]  ;;  %v1835_v48 = vld [vmem:[%s2892_s6 + $0x18c] sm:$0xf] }
  0x95   :  { %v129_v55 = vsel %vm128_vm5, 1, %v1922_v0  ;;  %v107_v57 = vsel %vm106_vm6, 1, %v1922_v0  ;;  %v138_v15 = vmul.u32 %v2095_v22, %v84_v10  ;;  %v1521_v46 = vor.u32 %v1838_v43, %v1520_v42  ;;  %v1894_v47 = vld [vmem:[%s2892_s6 + $0x360] sm:$0xf0]  ;;  %v1688_v10 = vld [vmem:[%s2892_s6 + $0x2d8] sm:$0xf] }
  0x96   :  { %v131_v58 = vadd.s32 %v129_v55, %v123_v49  ;;  %vm132_vm7 = vc.u32 %v130_v52, %v126_v51  ;;  %v109_v60 = vadd.s32 %v107_v57, %v101_v50  ;;  %vm110_vm8 = vc.u32 %v108_v54, %v104_v53  ;;  %v1522_v49 = vld [vmem:[%s2892_s6 + $0x1a4] sm:$0xf0]  ;;  %v1492_v54 = vld [vmem:[%s2892_s6 + $0x150] sm:$0xf]  ;;  %v1866_v42 = vld [vmem:[%s2892_s6 + $0x280] sm:$0xf0] }
  0x97   :  { %v133_v62 = vsel %vm132_vm7, 1, %v1922_v0  ;;  %v111_v63 = vsel %vm110_vm8, 1, %v1922_v0  ;;  %v134_v0 = vadd.s32 %v130_v52, %v126_v51  ;;  %v1745_v50 = vor.u32 %v1894_v47, %v1744_v44  ;;  %v1891_v52 = vld [vmem:[%s2892_s6 + $0x34c] sm:$0xf]  ;;  %v1746_v53 = vld [vmem:[%s2892_s6 + $0x364] sm:$0xf0]  ;;  %1055 = vmatpush.bf16.msra.mxu2 %v1521_v46 }
  0x98   :  { %v135_v3 = vadd.s32 %v133_v62, %v131_v58  ;;  %v113_v7 = vadd.s32 %v111_v63, %v109_v60  ;;  %v1525_v51 = vor.u32 %v1835_v48, %v1522_v49  ;;  %v1749_v57 = vor.u32 %v1891_v52, %v1746_v53  ;;  %v1831_v58 = vld [vmem:[%s2892_s6 + $0x168] sm:$0xf0]  ;;  %v1828_v63 = vld [vmem:[%s2892_s6 + $0x154] sm:$0xf]  ;;  %v1410_v44 = vld [vmem:[%s2892_s6 + $0xc4] sm:$0xf0] }
  0x99   :  { %1068 = vmatpush.bf16.msra.mxu3 %v1745_v50  ;;  %v1493_v60 = vor.u32 %v1831_v58, %v1492_v54  ;;  %v1887_v62 = vld [vmem:[%s2892_s6 + $0x328] sm:$0xf0]  ;;  %v1634_v46 = vld [vmem:[%s2892_s6 + $0x284] sm:$0xf0]  ;;  %v1380_v52 = vld [vmem:[%s2892_s6 + $0x70] sm:$0xf] }
  0x9a   :  { %v136_v9 = vadd.s32 %v135_v3, %v125_v2  ;;  %v114_v61 = vadd.s32 %v113_v7, %v103_v6  ;;  %1081 = vmatpush.bf16.msrb.mxu0 %v1525_v51  ;;  %v1494_v2 = vld [vmem:[%s2892_s6 + $0x16c] sm:$0xf0]  ;;  %1094 = vmatpush.bf16.msrb.mxu1 %v1749_v57  ;;  %v1717_v4 = vor.u32 %v1887_v62, %v1716_v59  ;;  %v1884_v6 = vld [vmem:[%s2892_s6 + $0x314] sm:$0xf]  ;;  %v1807_v43 = vld [vmem:[%s2892_s6 + $0xac] sm:$0xf] }
  0x9b   :  { %v1497_v5 = vor.u32 %v1828_v63, %v1494_v2  ;;  %v1718_v7 = vld [vmem:[%s2892_s6 + $0x32c] sm:$0xf0]  ;;  %1056 = vmatpush.bf16.msra.mxu2 %v1493_v60  ;;  %v1413_v51 = vor.u32 %v1807_v43, %v1410_v44  ;;  %v1803_v53 = vld [vmem:[%s2892_s6 + $0x88] sm:$0xf0]  ;;  %v1800_v60 = vld [vmem:[%s2892_s6 + $0x74] sm:$0xf] }
  0x9c   :  { %v137_v12 = vadd.s32 %v136_v9, %v127_v8  ;;  %v115_v13 = vadd.s32 %v114_v61, %v105_v11  ;;  %v1464_v8 = vld [vmem:[%s2892_s6 + $0x118] sm:$0xf]  ;;  %v1721_v11 = vor.u32 %v1884_v6, %v1718_v7  ;;  %v1824_v61 = vld [vmem:[%s2892_s6 + $0x130] sm:$0xf0]  ;;  %v1604_v54 = vld [vmem:[%s2892_s6 + $0x230] sm:$0xf]  ;;  %v1381_v6 = vor.u32 %v1803_v53, %v1380_v52 }
  0x9d   :  { %1069 = vmatpush.bf16.msra.mxu3 %v1717_v4  ;;  %v1859_v59 = vld [vmem:[%s2892_s6 + $0x248] sm:$0xf0]  ;;  %v1382_v62 = vld [vmem:[%s2892_s6 + $0x8c] sm:$0xf0]  ;;  %v1856_v2 = vld [vmem:[%s2892_s6 + $0x234] sm:$0xf] }
  0x9e   :  { %v141_v14 = vadd.s32 1, %v137_v12  ;;  %vm140_vm9 = vc.u32 %v115_v13, %v134_v0  ;;  %v139_v27 = vadd.s32 %v134_v0, %v115_v13  ;;  %v1465_v0 = vor.u32 %v1824_v61, %v1464_v8  ;;  %1082 = vmatpush.bf16.msrb.mxu0 %v1497_v5  ;;  %1095 = vmatpush.bf16.msrb.mxu1 %v1721_v11  ;;  %v1352_v7 = vld [vmem:[%s2892_s6 + $0x38] sm:$0xf]  ;;  %v1796_v11 = vld [vmem:[%s2892_s6 + $0x50] sm:$0xf0] }
  0x9f   :  { %v1605_v8 = vor.u32 %v1859_v59, %v1604_v54  ;;  %v1576_v61 = vld [vmem:[%s2892_s6 + $0x1f8] sm:$0xf]  ;;  %v1892_v44 = vld [vmem:[%s2892_s6 + $0x354] sm:$0xf]  ;;  %v1885_v59 = vld [vmem:[%s2892_s6 + $0x31c] sm:$0xf] }
  0xa0   :  { %v142_v16 = vsel %vm140_vm9, %v141_v14, %v137_v12  ;;  %v1880_v12 = vld [vmem:[%s2892_s6 + $0x2f0] sm:$0xf0]  ;;  %v1821_v14 = vld [vmem:[%s2892_s6 + $0x11c] sm:$0xf]  ;;  %1057 = vmatpush.bf16.msra.mxu2 %v1465_v0  ;;  %v1724_v53 = vld [vmem:[%s2892_s6 + $0x318] sm:$0xf] }
  0xa1   :  { %v143_v17 = vadd.s32 %v142_v16, %v138_v15  ;;  %v1466_v15 = vld [vmem:[%s2892_s6 + $0x134] sm:$0xf0]  ;;  %v1877_v16 = vld [vmem:[%s2892_s6 + $0x2dc] sm:$0xf]  ;;  %v1832_v52 = vld [vmem:[%s2892_s6 + $0x170] sm:$0xf0] }
  0xa3   :  { %v144_v18 = vadd.s32 536870912, %v143_v17 }
  0xa5   :  { %v145_v19 = vshrl.u32 %v144_v18, 30  ;;  %v1469_v18 = vor.u32 %v1821_v14, %v1466_v15  ;;  %v1793_v14 = vld [vmem:[%s2892_s6 + $0x3c] sm:$0xf]  ;;  %v1354_v15 = vld [vmem:[%s2892_s6 + $0x54] sm:$0xf0] }
  0xa7   :  { %v146_v20 = vshll.u32 %v145_v19, 30  ;;  %v169_v31 = vsub.s32 4, %v145_v19  ;;  %1083 = vmatpush.bf16.msrb.mxu0 %v1469_v18  ;;  %v200_v18 = vld [vmem:[%s2893_s1] sm:$0xff] }
  0xa9   :  { %v147_v21 = vsub.s32 %v143_v17, %v146_v20  ;;  %v170_v36 = vsel %vm47_vm12, %v169_v31, %v145_v19  ;;  %v1689_v17 = vor.u32 %v1880_v12, %v1688_v10  ;;  %v1690_v19 = vld [vmem:[%s2892_s6 + $0x2f4] sm:$0xf0]  ;;  %v1436_v20 = vld [vmem:[%s2892_s6 + $0xe0] sm:$0xf]  ;;  %v1852_v10 = vld [vmem:[%s2892_s6 + $0x210] sm:$0xf0] }
  0xaa   :  { %v172_v41 = vsel %vm2138_vm13, 0, %v170_v36  ;;  %v1408_v36 = vld [vmem:[%s2892_s6 + $0xa8] sm:$0xf] }
  0xab   :  { %vm148_vm10 = vcmp.lt.s32.totalorder %v147_v21, 0  ;;  %v149_v23 = vsub.s32 0, %v147_v21  ;;  %v2171_v56 = vadd.s32 3, %v172_v41  ;;  %1070 = vmatpush.bf16.msra.mxu3 %v1689_v17  ;;  %v1632_v41 = vld [vmem:[%s2892_s6 + $0x268] sm:$0xf] }
  0xac   :  { %v1633_v50 = vor.u32 %v1866_v42, %v1632_v41  ;;  %v1530_v41 = vld [vmem:[%s2892_s6 + $0x1ac] sm:$0xf0] }
  0xad   :  { %v150_v24 = vsel %vm148_vm10, %v149_v23, %v147_v21  ;;  %v190_v63 = vand.u32 3, %v2171_v56  ;;  %v1385_v56 = vor.u32 %v1800_v60, %v1382_v62  ;;  %v1726_v60 = vld [vmem:[%s2892_s6 + $0x334] sm:$0xf0] }
  0xae   :  { %v151_v25 = vclz %v150_v24 }
  0xaf   :  { %vm191_vm14 = vcmp.lt.s32.totalorder %v190_v63, 2  ;;  %vm192_vm15 = vcmp.eq.s32.totalorder %v190_v63, 0  ;;  %vm195_vm0 = vcmp.eq.s32.totalorder %v190_v63, 2 }
  0xb0   :  { %v1256_v26 = vadd.s32 4294967294, %v151_v25  ;;  %v1693_v25 = vor.u32 %v1877_v16, %v1690_v19  ;;  %v1849_v16 = vld [vmem:[%s2892_s6 + $0x1fc] sm:$0xf]  ;;  %v1353_v19 = vor.u32 %v1796_v11, %v1352_v7  ;;  %v1878_v11 = vld [vmem:[%s2892_s6 + $0x2e4] sm:$0xf] }
  0xb1   :  { %v1881_v7 = vld [vmem:[%s2892_s6 + $0x2f8] sm:$0xf0] }
  0xb2   :  { %vm1257_vm11 = vcmp.lt.s32.totalorder %v1256_v26, 0  ;;  %1096 = vmatpush.bf16.msrb.mxu1 %v1693_v25  ;;  %v1548_v25 = vld [vmem:[%s2892_s6 + $0x1c0] sm:$0xf] }
  0xb3   :  { %v154_v1 = vsel %vm1257_vm11, 0, %v1256_v26  ;;  %v1660_v26 = vld [vmem:[%s2892_s6 + $0x2a0] sm:$0xf] }
  0xb4   :  { %v155_v28 = vsub.s32 32, %v154_v1  ;;  %v159_v30 = vsub.s32 4294967266, %v154_v1  ;;  %v156_v32 = vshll.u32 %v147_v21, %v154_v1  ;;  %v1817_v21 = vld [vmem:[%s2892_s6 + $0xf8] sm:$0xf0] }
  0xb5   :  { %v1873_v1 = vld [vmem:[%s2892_s6 + $0x2b8] sm:$0xf0] }
  0xb6   :  { %v157_v22 = vshrl.u32 %v139_v27, %v155_v28  ;;  %v160_v33 = vadd.s32 127, %v159_v30  ;;  %v1814_v27 = vld [vmem:[%s2892_s6 + $0xe4] sm:$0xf]  ;;  %v1438_v28 = vld [vmem:[%s2892_s6 + $0xfc] sm:$0xf0] }
  0xb8   :  { %v158_v34 = vor.u32 %v157_v22, %v156_v32  ;;  %v161_v35 = vshll.u32 %v160_v33, 23  ;;  %v1437_v32 = vor.u32 %v1817_v21, %v1436_v20  ;;  %v1870_v22 = vld [vmem:[%s2892_s6 + $0x2a4] sm:$0xf]  ;;  %v1661_v33 = vor.u32 %v1873_v1, %v1660_v26 }
  0xb9   :  { %v1577_v20 = vor.u32 %v1852_v10, %v1576_v61  ;;  %v1357_v21 = vor.u32 %v1793_v14, %v1354_v15  ;;  %v1698_v61 = vld [vmem:[%s2892_s6 + $0x2fc] sm:$0xf0]  ;;  %v1818_v14 = vld [vmem:[%s2892_s6 + $0x100] sm:$0xf0]  ;;  %v1668_v15 = vld [vmem:[%s2892_s6 + $0x2a8] sm:$0xf] }
  0xba   :  { %v162_v37 = vor.u32 4788187, %v161_v35  ;;  %v165_v40 = vcvt.s32.f32 %v158_v34  ;;  %v1441_v34 = vor.u32 %v1814_v27, %v1438_v28  ;;  %v1662_v35 = vld [vmem:[%s2892_s6 + $0x2bc] sm:$0xf0]  ;;  %1058 = vmatpush.bf16.msra.mxu2 %v1437_v32  ;;  %1071 = vmatpush.bf16.msra.mxu3 %v1661_v33  ;;  %v1845_v28 = vld [vmem:[%s2892_s6 + $0x1d8] sm:$0xf0] }
  0xbb   :  { %v1550_v33 = vld [vmem:[%s2892_s6 + $0x1dc] sm:$0xf0]  ;;  %v1549_v42 = vor.u32 %v1845_v28, %v1548_v25  ;;  %v1416_v25 = vld [vmem:[%s2892_s6 + $0xb0] sm:$0xf]  ;;  %v1867_v28 = vld [vmem:[%s2892_s6 + $0x288] sm:$0xf0] }
  0xbc   :  { %v163_v39 = vand.u32 2147483647, %v162_v37  ;;  %v1810_v37 = vld [vmem:[%s2892_s6 + $0xc0] sm:$0xf0]  ;;  %1084 = vmatpush.bf16.msrb.mxu0 %v1441_v34  ;;  %v1528_v34 = vld [vmem:[%s2892_s6 + $0x190] sm:$0xf] }
  0xbd   :  { %v1409_v49 = vor.u32 %v1810_v37, %v1408_v36  ;;  %v1752_v37 = vld [vmem:[%s2892_s6 + $0x350] sm:$0xf] }
  0xbe   :  { %v166_v45 = vmul.f32 %v165_v40, %v163_v39  ;;  %v1665_v40 = vor.u32 %v1870_v22, %v1662_v35  ;;  %1072 = vmatpush.bf16.msra.mxu3 %v1633_v50  ;;  %v1842_v22 = vld [vmem:[%s2892_s6 + $0x1c4] sm:$0xf] }
  0xbf   :  { %1059 = vmatpush.bf16.msra.mxu2 %v1409_v49 }
  0xc0   :  { %v167_v55 = vxor.u32 2147483648, %v166_v45  ;;  %1097 = vmatpush.bf16.msrb.mxu1 %v1665_v40  ;;  %1085 = vmatpush.bf16.msrb.mxu0 %v1413_v51  ;;  %v1836_v40 = vld [vmem:[%s2892_s6 + $0x194] sm:$0xf]  ;;  %v1500_v51 = vld [vmem:[%s2892_s6 + $0x158] sm:$0xf] }
  0xc1   :  { %v1533_v50 = vor.u32 %v1836_v40, %v1530_v41  ;;  %v1501_v62 = vor.u32 %v1832_v52, %v1500_v51  ;;  %v1801_v40 = vld [vmem:[%s2892_s6 + $0x7c] sm:$0xf]  ;;  %v1390_v41 = vld [vmem:[%s2892_s6 + $0x94] sm:$0xf0]  ;;  %v1584_v51 = vld [vmem:[%s2892_s6 + $0x200] sm:$0xf] }
  0xc2   :  { %v168_v3 = vsel %vm47_vm12, %v167_v55, %v166_v45  ;;  %v1863_v45 = vld [vmem:[%s2892_s6 + $0x26c] sm:$0xf]  ;;  %1073 = vmatpush.bf16.msra.mxu3 %v1605_v8  ;;  %v1822_v8 = vld [vmem:[%s2892_s6 + $0x124] sm:$0xf]  ;;  %v1853_v52 = vld [vmem:[%s2892_s6 + $0x218] sm:$0xf0] }
  0xc3   :  { %v2202_v9 = vsel %vm2138_vm13, %v2032_v29, %v168_v3  ;;  %v1637_v58 = vor.u32 %v1863_v45, %v1634_v46  ;;  %v1606_v3 = vld [vmem:[%s2892_s6 + $0x24c] sm:$0xf0]  ;;  %1060 = vmatpush.bf16.msra.mxu2 %v1381_v6  ;;  %v1839_v29 = vld [vmem:[%s2892_s6 + $0x1a8] sm:$0xf0]  ;;  %v1729_v6 = vor.u32 %v1885_v59, %v1726_v60 }
  0xc4   :  { %v173_v13 = vmul.f32 %v2202_v9, %v2202_v9  ;;  %v1609_v0 = vor.u32 %v1856_v2, %v1606_v3  ;;  %1086 = vmatpush.bf16.msrb.mxu0 %v1385_v56  ;;  %v1754_v45 = vld [vmem:[%s2892_s6 + $0x36c] sm:$0xf0]  ;;  %v1472_v3 = vld [vmem:[%s2892_s6 + $0x120] sm:$0xf] }
  0xc5   :  { %1098 = vmatpush.bf16.msrb.mxu1 %v1637_v58  ;;  %v1757_v54 = vor.u32 %v1892_v44, %v1754_v45  ;;  %v1502_v58 = vld [vmem:[%s2892_s6 + $0x174] sm:$0xf0]  ;;  %v1474_v56 = vld [vmem:[%s2892_s6 + $0x13c] sm:$0xf0] }
  0xc6   :  { %v174_v23 = vmul.f32 -0.001358992, %v173_v13  ;;  %v181_v24 = vmul.f32 -0.00019511016, %v173_v13  ;;  %1074 = vmatpush.bf16.msra.mxu3 %v1577_v20  ;;  %v1670_v20 = vld [vmem:[%s2892_s6 + $0x2c4] sm:$0xf0] }
  0xc7   :  { %1061 = vmatpush.bf16.msra.mxu2 %v1353_v19  ;;  %v1871_v19 = vld [vmem:[%s2892_s6 + $0x2ac] sm:$0xf] }
  0xc8   :  { %v175_v30 = vadd.f32 0.041655596, %v174_v23  ;;  %v182_v31 = vadd.f32 0.008332121, %v181_v24  ;;  %v1324_v23 = vld [vmem:[%s2892_s6] sm:$0xf]  ;;  %1087 = vmatpush.bf16.msrb.mxu0 %v1357_v21 }
  0xc9   :  { %v1789_v24 = vld [vmem:[%s2892_s6 + $0x18] sm:$0xf0]  ;;  %1099 = vmatpush.bf16.msrb.mxu1 %v1609_v0  ;;  %v1444_v0 = vld [vmem:[%s2892_s6 + $0xe8] sm:$0xf] }
  0xca   :  { %v176_v38 = vmul.f32 %v175_v30, %v173_v13  ;;  %v183_v39 = vmul.f32 %v182_v31, %v173_v13  ;;  %v1786_v30 = vld [vmem:[%s2892_s6 + $0x4] sm:$0xf]  ;;  %v1326_v31 = vld [vmem:[%s2892_s6 + $0x1c] sm:$0xf0]  ;;  %v1325_v36 = vor.u32 %v1789_v24, %v1324_v23  ;;  %1075 = vmatpush.bf16.msra.mxu3 %v1549_v42  ;;  %v1445_v21 = vor.u32 %v1818_v14, %v1444_v0  ;;  %v1857_v42 = vld [vmem:[%s2892_s6 + $0x23c] sm:$0xf] }
  0xcb   :  { %v1329_v43 = vor.u32 %v1786_v30, %v1326_v31  ;;  %v1808_v30 = vld [vmem:[%s2892_s6 + $0xb4] sm:$0xf]  ;;  %v1418_v31 = vld [vmem:[%s2892_s6 + $0xcc] sm:$0xf0] }
  0xcc   :  { %v177_v47 = vadd.f32 -0.4999988, %v176_v38  ;;  %v184_v48 = vadd.f32 -0.16666654, %v183_v39  ;;  %v1895_v39 = vld [vmem:[%s2892_s6 + $0x368] sm:$0xf0]  ;;  %1062 = vmatpush.bf16.msra.mxu2 %v1325_v36 }
  0xcd   :  { %v1753_v49 = vor.u32 %v1895_v39, %v1752_v37  ;;  %1088 = vmatpush.bf16.msrb.mxu0 %v1329_v43  ;;  %v1388_v36 = vld [vmem:[%s2892_s6 + $0x78] sm:$0xf]  ;;  %v1860_v39 = vld [vmem:[%s2892_s6 + $0x250] sm:$0xf0] }
  0xce   :  { %v178_v55 = vmul.f32 %v177_v47, %v173_v13  ;;  %v185_v57 = vmul.f32 %v184_v48, %v173_v13  ;;  %v1553_v47 = vor.u32 %v1842_v22, %v1550_v33  ;;  %v1529_v48 = vor.u32 %v1839_v29, %v1528_v34  ;;  %v1642_v22 = vld [vmem:[%s2892_s6 + $0x28c] sm:$0xf0]  ;;  %v1804_v29 = vld [vmem:[%s2892_s6 + $0x90] sm:$0xf0]  ;;  %v1612_v37 = vld [vmem:[%s2892_s6 + $0x238] sm:$0xf] }
  0xcf   :  { %1120 = vmatpush.bf16.msrb.mxu3 %v1753_v49  ;;  %v1614_v43 = vld [vmem:[%s2892_s6 + $0x254] sm:$0xf0]  ;;  %v1389_v44 = vor.u32 %v1804_v29, %v1388_v36  ;;  %v1613_v45 = vor.u32 %v1860_v39, %v1612_v37  ;;  %v1797_v49 = vld [vmem:[%s2892_s6 + $0x58] sm:$0xf0]  ;;  %v1830_v36 = vld [vmem:[%s2892_s6 + $0x164] sm:$0xf] }
  0xd0   :  { %v179_v4 = vadd.f32 1.0, %v178_v55  ;;  %v186_v5 = vadd.f32 1.0, %v185_v57  ;;  %v1888_v55 = vld [vmem:[%s2892_s6 + $0x330] sm:$0xf0]  ;;  %v1829_v57 = vld [vmem:[%s2892_s6 + $0x15c] sm:$0xf]  ;;  %1107 = vmatpush.bf16.msrb.mxu2 %v1529_v48 }
  0xd1   :  { %v1725_v63 = vor.u32 %v1888_v55, %v1724_v53  ;;  %v1505_v2 = vor.u32 %v1829_v57, %v1502_v58  ;;  %v1360_v48 = vld [vmem:[%s2892_s6 + $0x40] sm:$0xf]  ;;  %v1794_v53 = vld [vmem:[%s2892_s6 + $0x44] sm:$0xf] }
  0xd2   :  { %v187_v12 = vmul.f32 %v186_v5, %v2202_v9  ;;  %v196_v13 = vxor.u32 2147483648, %v179_v4  ;;  %v1578_v9 = vld [vmem:[%s2892_s6 + $0x214] sm:$0xf0]  ;;  %v1696_v5 = vld [vmem:[%s2892_s6 + $0x2e0] sm:$0xf] }
  0xd3   :  { %v1581_v27 = vor.u32 %v1849_v16, %v1578_v9  ;;  %1121 = vmatpush.bf16.msrb.mxu3 %v1725_v63  ;;  %v1701_v16 = vor.u32 %v1878_v11, %v1698_v61  ;;  %v1874_v9 = vld [vmem:[%s2892_s6 + $0x2c0] sm:$0xf0]  ;;  %v1362_v55 = vld [vmem:[%s2892_s6 + $0x5c] sm:$0xf0]  ;;  %v1558_v11 = vld [vmem:[%s2892_s6 + $0x1e4] sm:$0xf0] }
  0xd4   :  { %v193_v17 = vxor.u32 2147483648, %v187_v12  ;;  %v197_v1 = vsel %vm195_vm0, %v196_v13, %v187_v12  ;;  %1108 = vmatpush.bf16.msrb.mxu2 %v1501_v62  ;;  %v1697_v12 = vor.u32 %v1881_v7, %v1696_v5  ;;  %v1477_v13 = vor.u32 %v1822_v8, %v1474_v56  ;;  %v1850_v57 = vld [vmem:[%s2892_s6 + $0x204] sm:$0xf]  ;;  %v1586_v58 = vld [vmem:[%s2892_s6 + $0x21c] sm:$0xf0] }
  0xd5   :  { %1100 = vmatpush.bf16.msrb.mxu1 %v1581_v27  ;;  %v1669_v23 = vor.u32 %v1874_v9, %v1668_v15  ;;  %v1673_v27 = vor.u32 %v1871_v19, %v1670_v20  ;;  %v1365_v59 = vor.u32 %v1794_v53, %v1362_v55  ;;  %v1589_v60 = vor.u32 %v1850_v57, %v1586_v58  ;;  %v1332_v62 = vld [vmem:[%s2892_s6 + $0x8] sm:$0xf]  ;;  %v1790_v63 = vld [vmem:[%s2892_s6 + $0x20] sm:$0xf0]  ;;  %v1843_v8 = vld [vmem:[%s2892_s6 + $0x1cc] sm:$0xf] }
  0xd6   :  { %v194_v26 = vsel %vm192_vm15, %v179_v4, %v193_v17  ;;  %v1825_v4 = vld [vmem:[%s2892_s6 + $0x138] sm:$0xf0]  ;;  %v1815_v17 = vld [vmem:[%s2892_s6 + $0xec] sm:$0xf]  ;;  %v1334_v7 = vld [vmem:[%s2892_s6 + $0x24] sm:$0xf0]  ;;  %v1561_v61 = vor.u32 %v1843_v8, %v1558_v11 }
  0xd7   :  { %v198_v32 = vsel %vm191_vm14, %v194_v26, %v197_v1  ;;  %v1473_v10 = vor.u32 %v1825_v4, %v1472_v3  ;;  %1122 = vmatpush.bf16.msrb.mxu3 %v1697_v12  ;;  %v1811_v26 = vld [vmem:[%s2892_s6 + $0xc8] sm:$0xf0]  ;;  %v1640_v1 = vld [vmem:[%s2892_s6 + $0x270] sm:$0xf]  ;;  %v1333_v3 = vor.u32 %v1790_v63, %v1332_v62  ;;  %v1846_v4 = vld [vmem:[%s2892_s6 + $0x1e0] sm:$0xf0] }
  0xd8   :  { %v199_v35 = vsel %vm188_vm1, nan, %v198_v32  ;;  %v1864_v32 = vld [vmem:[%s2892_s6 + $0x274] sm:$0xf]  ;;  %v1417_v33 = vor.u32 %v1811_v26, %v1416_v25  ;;  %v1641_v34 = vor.u32 %v1867_v28, %v1640_v1  ;;  %v1536_v9 = vld [vmem:[%s2892_s6 + $0x198] sm:$0xf] }
  0xd9   :  { %v201_v38 = vadd.f32 %v200_v18, %v199_v35  ;;  %1101 = vmatpush.bf16.msrb.mxu1 %v1553_v47  ;;  %v1446_v18 = vld [vmem:[%s2892_s6 + $0x104] sm:$0xf0]  ;;  %1109 = vmatpush.bf16.msrb.mxu2 %v1473_v10  ;;  %v1421_v35 = vor.u32 %v1808_v30, %v1418_v31  ;;  %v1617_v47 = vor.u32 %v1857_v42, %v1614_v43  ;;  %v219_v10 = vld [vmem:[%s2894_s5] sm:$0x3]  ;;  %v1896_v19 = vld [vmem:[%s2892_s6 + $0x370] sm:$0xf0] }
  0xda   :  { %v1449_v24 = vor.u32 %v1815_v17, %v1446_v18  ;;  %v221_v12 = vperm.slane %v219_v10, 0  ;;  %v1840_v17 = vld [vmem:[%s2892_s6 + $0x1b0] sm:$0xf0]  ;;  %v1760_v18 = vld [vmem:[%s2892_s6 + $0x358] sm:$0xf] }
  0xdb   :  { %v202_v46 = vpack.c.bf16 %v201_v38, %v201_v38  ;;  %1123 = vmatpush.bf16.msrb.mxu3 %v1669_v23  ;;  %v1645_v38 = vor.u32 %v1864_v32, %v1642_v22  ;;  %v1837_v20 = vld [vmem:[%s2892_s6 + $0x19c] sm:$0xf]  ;;  %v1762_v26 = vld [vmem:[%s2892_s6 + $0x374] sm:$0xf0]  ;;  %v1537_v28 = vor.u32 %v1840_v17, %v1536_v9  ;;  %v1761_v30 = vor.u32 %v1896_v19, %v1760_v18  ;;  %v1508_v31 = vld [vmem:[%s2892_s6 + $0x160] sm:$0xf] }
  0xdc   :  { %v1893_v25 = vld [vmem:[%s2892_s6 + $0x35c] sm:$0xf]  ;;  %v1510_v29 = vld [vmem:[%s2892_s6 + $0x17c] sm:$0xf0]  ;;  %v1886_v37 = vld [vmem:[%s2892_s6 + $0x324] sm:$0xf] }
  0xdd   :  { %313 = vmatmul.bf16.vlgmr.msra.gmra.mxu0 %v202_v46  ;;  %326 = vmatmul.bf16.vlgmr.msra.gmra.mxu1 %v202_v46  ;;  %v1393_v46 = vor.u32 %v1801_v40, %v1390_v41  ;;  %v1833_v32 = vld [vmem:[%s2892_s6 + $0x178] sm:$0xf0]  ;;  %v1480_v43 = vld [vmem:[%s2892_s6 + $0x128] sm:$0xf]  ;;  %v1452_v55 = vld [vmem:[%s2892_s6 + $0xf0] sm:$0xf] }
  0xde   :  { %1133 = vmatpush.bf16.msra.mxu0 %v1533_v50  ;;  %1146 = vmatpush.bf16.msra.mxu1 %v1757_v54  ;;  %v1361_v50 = vor.u32 %v1797_v49, %v1360_v48  ;;  %v1585_v54 = vor.u32 %v1853_v52, %v1584_v51  ;;  %v1509_v41 = vor.u32 %v1833_v32, %v1508_v31  ;;  %v1882_v48 = vld [vmem:[%s2892_s6 + $0x300] sm:$0xf0]  ;;  %v1823_v49 = vld [vmem:[%s2892_s6 + $0x12c] sm:$0xf]  ;;  %v1706_v52 = vld [vmem:[%s2892_s6 + $0x304] sm:$0xf0] }
  0xdf   :  { %1110 = vmatpush.bf16.msrb.mxu2 %v1445_v21  ;;  %1124 = vmatpush.bf16.msrb.mxu3 %v1641_v34  ;;  %v1538_v21 = vld [vmem:[%s2892_s6 + $0x1b4] sm:$0xf0]  ;;  %v1732_v34 = vld [vmem:[%s2892_s6 + $0x320] sm:$0xf]  ;;  %v1879_v51 = vld [vmem:[%s2892_s6 + $0x2ec] sm:$0xf] }
  0xe0   :  { %v1541_v22 = vor.u32 %v1837_v20, %v1538_v21  ;;  %v1819_v57 = vld [vmem:[%s2892_s6 + $0x108] sm:$0xf0]  ;;  %v1816_v63 = vld [vmem:[%s2892_s6 + $0xf4] sm:$0xf]  ;;  %v1396_v9 = vld [vmem:[%s2892_s6 + $0x80] sm:$0xf] }
  0xe1   :  { %v1875_v62 = vld [vmem:[%s2892_s6 + $0x2c8] sm:$0xf0]  ;;  %v1812_v8 = vld [vmem:[%s2892_s6 + $0xd0] sm:$0xf0]  ;;  %v1805_v17 = vld [vmem:[%s2892_s6 + $0x98] sm:$0xf0] }
  0xe2   :  { %1134 = vmatpush.bf16.msra.mxu0 %v1505_v2  ;;  %1147 = vmatpush.bf16.msra.mxu1 %v1729_v6  ;;  %v1556_v2 = vld [vmem:[%s2892_s6 + $0x1c8] sm:$0xf]  ;;  %v1787_v6 = vld [vmem:[%s2892_s6 + $0xc] sm:$0xf]  ;;  %v1620_v20 = vld [vmem:[%s2892_s6 + $0x240] sm:$0xf] }
  0xe3   :  { %1111 = vmatpush.bf16.msrb.mxu2 %v1417_v33  ;;  %1125 = vmatpush.bf16.msrb.mxu3 %v1613_v45  ;;  %v1557_v5 = vor.u32 %v1846_v4, %v1556_v2  ;;  %v1337_v56 = vor.u32 %v1787_v6, %v1334_v7  ;;  %v1765_v33 = vor.u32 %v1893_v25, %v1762_v26  ;;  %v1454_v2 = vld [vmem:[%s2892_s6 + $0x10c] sm:$0xf0]  ;;  %v1424_v7 = vld [vmem:[%s2892_s6 + $0xb8] sm:$0xf]  ;;  %v1861_v21 = vld [vmem:[%s2892_s6 + $0x258] sm:$0xf0] }
  0xe4   :  { %v1513_v45 = vor.u32 %v1830_v36, %v1510_v29  ;;  %v1678_v4 = vld [vmem:[%s2892_s6 + $0x2cc] sm:$0xf0]  ;;  %v1858_v25 = vld [vmem:[%s2892_s6 + $0x244] sm:$0xf]  ;;  %v1622_v26 = vld [vmem:[%s2892_s6 + $0x25c] sm:$0xf0] }
  0xe5   :  { %v1368_v31 = vld [vmem:[%s2892_s6 + $0x48] sm:$0xf]  ;;  %v1798_v32 = vld [vmem:[%s2892_s6 + $0x60] sm:$0xf0]  ;;  %v1795_v36 = vld [vmem:[%s2892_s6 + $0x4c] sm:$0xf] }
  0xe6   :  { %1135 = vmatpush.bf16.msra.mxu0 %v1477_v13  ;;  %1148 = vmatpush.bf16.msra.mxu1 %v1701_v16  ;;  %v222_v13 = vperm.slane %v219_v10, 1  ;;  %v1868_v10 = vld [vmem:[%s2892_s6 + $0x290] sm:$0xf0]  ;;  %v1370_v29 = vld [vmem:[%s2892_s6 + $0x64] sm:$0xf0] }
  0xe7   :  { %1112 = vmatpush.bf16.msrb.mxu2 %v1389_v44  ;;  %1126 = vmatpush.bf16.msrb.mxu3 %v1585_v54  ;;  %v1826_v44 = vld [vmem:[%s2892_s6 + $0x140] sm:$0xf0] }
  0xe8   :  { %v1481_v53 = vor.u32 %v1826_v44, %v1480_v43  ;;  %v1564_v43 = vld [vmem:[%s2892_s6 + $0x1d0] sm:$0xf]  ;;  %v1373_v44 = vor.u32 %v1795_v36, %v1370_v29  ;;  %v1348_v36 = vld [vmem:[%s2892_s6 + $0x18] sm:$0xf]  ;;  %v1792_v29 = vld [vmem:[%s2892_s6 + $0x30] sm:$0xf0] }
  0xea   :  { %1136 = vmatpush.bf16.msra.mxu0 %v1449_v24  ;;  %1149 = vmatpush.bf16.msra.mxu1 %v1673_v27 }
  0xeb   :  { %1113 = vmatpush.bf16.msrb.mxu2 %v1361_v50  ;;  %1127 = vmatpush.bf16.msrb.mxu3 %v1557_v5  ;;  %v1482_v50 = vld [vmem:[%s2892_s6 + $0x144] sm:$0xf0]  ;;  %v1453_v5 = vor.u32 %v1819_v57, %v1452_v55 }
  0xec   :  { %v1485_v58 = vor.u32 %v1823_v49, %v1482_v50  ;;  %v1844_v49 = vld [vmem:[%s2892_s6 + $0x1d4] sm:$0xf]  ;;  %v1566_v50 = vld [vmem:[%s2892_s6 + $0x1ec] sm:$0xf0] }
  0xee   :  { %1137 = vmatpush.bf16.msra.mxu0 %v1421_v35  ;;  %1150 = vmatpush.bf16.msra.mxu1 %v1645_v38  ;;  %v1889_v35 = vld [vmem:[%s2892_s6 + $0x338] sm:$0xf0]  ;;  %v1734_v38 = vld [vmem:[%s2892_s6 + $0x33c] sm:$0xf0] }
  0xef   :  { %1114 = vmatpush.bf16.msrb.mxu2 %v1333_v3  ;;  %v1733_v42 = vor.u32 %v1889_v35, %v1732_v34  ;;  %v1872_v3 = vld [vmem:[%s2892_s6 + $0x2b4] sm:$0xf]  ;;  %v1592_v34 = vld [vmem:[%s2892_s6 + $0x208] sm:$0xf]  ;;  %v1854_v35 = vld [vmem:[%s2892_s6 + $0x220] sm:$0xf0] }
  0xf0   :  { %v1681_v11 = vor.u32 %v1872_v3, %v1678_v4  ;;  %v1740_v3 = vld [vmem:[%s2892_s6 + $0x328] sm:$0xf]  ;;  %v1890_v4 = vld [vmem:[%s2892_s6 + $0x340] sm:$0xf0] }
  0xf2   :  { %1138 = vmatpush.bf16.msra.mxu0 %v1393_v46  ;;  %1151 = vmatpush.bf16.msra.mxu1 %v1617_v47  ;;  %v1737_v46 = vor.u32 %v1886_v37, %v1734_v38  ;;  %v1704_v47 = vld [vmem:[%s2892_s6 + $0x2e8] sm:$0xf]  ;;  %v1851_v37 = vld [vmem:[%s2892_s6 + $0x20c] sm:$0xf] }
  0xf3   :  { %v1705_v54 = vor.u32 %v1882_v48, %v1704_v47  ;;  %v1594_v38 = vld [vmem:[%s2892_s6 + $0x224] sm:$0xf0]  ;;  %v1788_v47 = vld [vmem:[%s2892_s6 + $0x14] sm:$0xf]  ;;  %v1342_v48 = vld [vmem:[%s2892_s6 + $0x2c] sm:$0xf0] }
  0xf6   :  { %1139 = vmatpush.bf16.msra.mxu0 %v1365_v59  ;;  %1152 = vmatpush.bf16.msra.mxu1 %v1589_v60  ;;  %v1709_v59 = vor.u32 %v1879_v51, %v1706_v52  ;;  %v1676_v60 = vld [vmem:[%s2892_s6 + $0x2b0] sm:$0xf]  ;;  %v1544_v51 = vld [vmem:[%s2892_s6 + $0x1a0] sm:$0xf]  ;;  %v1841_v52 = vld [vmem:[%s2892_s6 + $0x1b8] sm:$0xf0] }
  0xf7   :  { %v1677_v6 = vor.u32 %v1875_v62, %v1676_v60  ;;  %v1545_v60 = vor.u32 %v1841_v52, %v1544_v51 }
  0xfa   :  { %1140 = vmatpush.bf16.msra.mxu0 %v1337_v56  ;;  %1153 = vmatpush.bf16.msra.mxu1 %v1561_v61  ;;  %v1457_v56 = vor.u32 %v1816_v63, %v1454_v2  ;;  %v1648_v61 = vld [vmem:[%s2892_s6 + $0x278] sm:$0xf]  ;;  %v1516_v63 = vld [vmem:[%s2892_s6 + $0x168] sm:$0xf]  ;;  %v1834_v2 = vld [vmem:[%s2892_s6 + $0x180] sm:$0xf0] }
 0x15a   :  { %v314_v0 = vpop.f32.mrf.mxu0  ;;  %v327_v14 = vpop.f32.mrf.mxu1 }
 0x15b   :  { %v315_v15 = vadd.f32 %v314_v0, %v221_v12  ;;  %v328_v16 = vadd.f32 %v327_v14, %v222_v13  ;;  %v1809_v12 = vld [vmem:[%s2892_s6 + $0xbc] sm:$0xf]  ;;  %v1426_v13 = vld [vmem:[%s2892_s6 + $0xd4] sm:$0xf0] }
 0x15c   :  { %v1865_v0 = vld [vmem:[%s2892_s6 + $0x27c] sm:$0xf]  ;;  %v1650_v14 = vld [vmem:[%s2892_s6 + $0x294] sm:$0xf0]  ;;  %v1429_v18 = vor.u32 %v1809_v12, %v1426_v13  ;;  %v1820_v13 = vld [vmem:[%s2892_s6 + $0x110] sm:$0xf0] }
 0x15d   :  { %v331_v23 = vmax.f32 %v315_v15, 0.0  ;;  %v332_v24 = vmax.f32 %v328_v16, 0.0  ;;  %v1425_v15 = vor.u32 %v1812_v8, %v1424_v7  ;;  %v1649_v16 = vor.u32 %v1868_v10, %v1648_v61  ;;  %v1488_v7 = vld [vmem:[%s2892_s6 + $0x130] sm:$0xf]  ;;  %v1827_v8 = vld [vmem:[%s2892_s6 + $0x148] sm:$0xf0] }
 0x15e   :  { %v1653_v19 = vor.u32 %v1865_v0, %v1650_v14  ;;  %v1489_v61 = vor.u32 %v1827_v8, %v1488_v7  ;;  %v1460_v12 = vld [vmem:[%s2892_s6 + $0xf8] sm:$0xf]  ;;  %v1876_v14 = vld [vmem:[%s2892_s6 + $0x2d0] sm:$0xf0] }
 0x15f   :  { %v2573_v1 = vpack.c.bf16 %v331_v23, %v331_v23  ;;  %v2575_v27 = vpack.c.bf16 %v332_v24, %v332_v24  ;;  %v1802_v23 = vld [vmem:[%s2892_s6 + $0x84] sm:$0xf]  ;;  %v1398_v24 = vld [vmem:[%s2892_s6 + $0x9c] sm:$0xf0]  ;;  %v1684_v0 = vld [vmem:[%s2892_s6 + $0x2b8] sm:$0xf] }
 0x161   :  { %1063 = vmatmul.bf16.vlgmr.msra.gmra.mxu2 %v2573_v1  ;;  %1076 = vmatmul.bf16.vlgmr.msra.gmra.mxu3 %v2575_v27 }
 0x162   :  { %1089 = vmatmul.bf16.vlgmr.msrb.gmra.mxu0 %v2573_v1  ;;  %1102 = vmatmul.bf16.vlgmr.msrb.gmra.mxu1 %v2575_v27  ;;  %v316_v39 = vpop.f32.mrf.mxu0  ;;  %v329_v40 = vpop.f32.mrf.mxu1 }
 0x163   :  { %1159 = vmatpush.bf16.msra.mxu2 %v1537_v28  ;;  %1172 = vmatpush.bf16.msra.mxu3 %v1761_v30  ;;  %v1397_v28 = vor.u32 %v1805_v17, %v1396_v9  ;;  %v1621_v30 = vor.u32 %v1861_v21, %v1620_v20  ;;  %v1369_v39 = vor.u32 %v1798_v32, %v1368_v31  ;;  %v1432_v9 = vld [vmem:[%s2892_s6 + $0xc0] sm:$0xf]  ;;  %v1813_v17 = vld [vmem:[%s2892_s6 + $0xd8] sm:$0xf0]  ;;  %v1376_v31 = vld [vmem:[%s2892_s6 + $0x50] sm:$0xf] }
 0x164   :  { %1185 = vmatpush.bf16.msrb.mxu0 %v1541_v22  ;;  %1198 = vmatpush.bf16.msrb.mxu1 %v1765_v33  ;;  %v1401_v22 = vor.u32 %v1802_v23, %v1398_v24  ;;  %v1625_v33 = vor.u32 %v1858_v25, %v1622_v26  ;;  %v1593_v40 = vor.u32 %v1854_v35, %v1592_v34  ;;  %v1404_v23 = vld [vmem:[%s2892_s6 + $0x88] sm:$0xf]  ;;  %v1806_v24 = vld [vmem:[%s2892_s6 + $0xa0] sm:$0xf0]  ;;  %v1799_v32 = vld [vmem:[%s2892_s6 + $0x68] sm:$0xf0] }
 0x165   :  { %v1433_v20 = vor.u32 %v1813_v17, %v1432_v9  ;;  %v1628_v25 = vld [vmem:[%s2892_s6 + $0x248] sm:$0xf]  ;;  %v1862_v26 = vld [vmem:[%s2892_s6 + $0x260] sm:$0xf0]  ;;  %v1377_v34 = vor.u32 %v1799_v32, %v1376_v31 }
 0x167   :  { %1160 = vmatpush.bf16.msra.mxu2 %v1509_v41  ;;  %1173 = vmatpush.bf16.msra.mxu3 %v1733_v42  ;;  %v1340_v41 = vld [vmem:[%s2892_s6 + $0x10] sm:$0xf]  ;;  %v1791_v42 = vld [vmem:[%s2892_s6 + $0x28] sm:$0xf0] }
 0x168   :  { %1186 = vmatpush.bf16.msrb.mxu0 %v1513_v45  ;;  %1199 = vmatpush.bf16.msrb.mxu1 %v1737_v46  ;;  %v1597_v45 = vor.u32 %v1851_v37, %v1594_v38  ;;  %v1847_v46 = vld [vmem:[%s2892_s6 + $0x1e8] sm:$0xf0]  ;;  %v1341_v55 = vor.u32 %v1791_v42, %v1340_v41  ;;  %v1572_v37 = vld [vmem:[%s2892_s6 + $0x1d8] sm:$0xf]  ;;  %v1848_v38 = vld [vmem:[%s2892_s6 + $0x1f0] sm:$0xf0] }
 0x169   :  { %v1565_v57 = vor.u32 %v1847_v46, %v1564_v43  ;;  %v2858_v41 = vld [vmem:[%s2895_s7] sm:$0xff] }
 0x16a   :  { %v466_v42 = vperm.slane %v2858_v41, 1  ;;  %v465_v46 = vperm.slane %v2858_v41, 0 }
 0x16b   :  { %1161 = vmatpush.bf16.msra.mxu2 %v1481_v53  ;;  %1174 = vmatpush.bf16.msra.mxu3 %v1705_v54  ;;  %v1768_v53 = vld [vmem:[%s2892_s6 + $0x360] sm:$0xf]  ;;  %v1897_v54 = vld [vmem:[%s2892_s6 + $0x378] sm:$0xf0] }
 0x16c   :  { %1187 = vmatpush.bf16.msrb.mxu0 %v1485_v58  ;;  %1200 = vmatpush.bf16.msrb.mxu1 %v1709_v59  ;;  %v1345_v58 = vor.u32 %v1788_v47, %v1342_v48  ;;  %v1569_v59 = vor.u32 %v1844_v49, %v1566_v50  ;;  %v1769_v62 = vor.u32 %v1897_v54, %v1768_v53 }
 0x16f   :  { %1162 = vmatpush.bf16.msra.mxu2 %v1453_v5  ;;  %1175 = vmatpush.bf16.msra.mxu3 %v1677_v6  ;;  %v1517_v5 = vor.u32 %v1834_v2, %v1516_v63  ;;  %v1741_v6 = vor.u32 %v1890_v4, %v1740_v3 }
 0x170   :  { %1188 = vmatpush.bf16.msrb.mxu0 %v1457_v56  ;;  %1201 = vmatpush.bf16.msrb.mxu1 %v1681_v11  ;;  %v1712_v56 = vld [vmem:[%s2892_s6 + $0x2f0] sm:$0xf]  ;;  %v1883_v11 = vld [vmem:[%s2892_s6 + $0x308] sm:$0xf0] }
 0x171   :  { %1115 = vmatmul.bf16.vlgmr.msrb.gmra.mxu2 %v2573_v1  ;;  %1128 = vmatmul.bf16.vlgmr.msrb.gmra.mxu3 %v2575_v27  ;;  %v1713_v10 = vor.u32 %v1883_v11, %v1712_v56 }
 0x172   :  { %1141 = vmatmul.bf16.vlgmr.msra.gmra.mxu0 %v2573_v1  ;;  %1154 = vmatmul.bf16.vlgmr.msra.gmra.mxu1 %v2575_v27 }
 0x173   :  { %1163 = vmatpush.bf16.msra.mxu2 %v1425_v15  ;;  %1176 = vmatpush.bf16.msra.mxu3 %v1649_v16  ;;  %v1461_v15 = vor.u32 %v1820_v13, %v1460_v12  ;;  %v1685_v16 = vor.u32 %v1876_v14, %v1684_v0  ;;  %v469_v14 = vperm.slane %v2858_v41, 4 }
 0x174   :  { %1189 = vmatpush.bf16.msrb.mxu0 %v1429_v18  ;;  %1202 = vmatpush.bf16.msrb.mxu1 %v1653_v19  ;;  %v1656_v18 = vld [vmem:[%s2892_s6 + $0x280] sm:$0xf]  ;;  %v1869_v19 = vld [vmem:[%s2892_s6 + $0x298] sm:$0xf0] }
 0x175   :  { %v1657_v21 = vor.u32 %v1869_v19, %v1656_v18 }
 0x177   :  { %1164 = vmatpush.bf16.msra.mxu2 %v1397_v28  ;;  %1177 = vmatpush.bf16.msra.mxu3 %v1621_v30  ;;  %v1405_v28 = vor.u32 %v1806_v24, %v1404_v23  ;;  %v1629_v30 = vor.u32 %v1862_v26, %v1628_v25  ;;  %v471_v26 = vperm.slane %v2858_v41, 6 }
 0x178   :  { %1190 = vmatpush.bf16.msrb.mxu0 %v1401_v22  ;;  %1203 = vmatpush.bf16.msrb.mxu1 %v1625_v33  ;;  %v1600_v22 = vld [vmem:[%s2892_s6 + $0x210] sm:$0xf]  ;;  %v1855_v33 = vld [vmem:[%s2892_s6 + $0x228] sm:$0xf0] }
 0x179   :  { %v1601_v35 = vor.u32 %v1855_v33, %v1600_v22 }
 0x17b   :  { %1165 = vmatpush.bf16.msra.mxu2 %v1369_v39  ;;  %1178 = vmatpush.bf16.msra.mxu3 %v1593_v40  ;;  %v1349_v39 = vor.u32 %v1792_v29, %v1348_v36  ;;  %v1573_v40 = vor.u32 %v1848_v38, %v1572_v37 }
 0x17c   :  { %1191 = vmatpush.bf16.msrb.mxu0 %v1373_v44  ;;  %1204 = vmatpush.bf16.msrb.mxu1 %v1597_v45 }
 0x17f   :  { %1166 = vmatpush.bf16.msra.mxu2 %v1341_v55  ;;  %1179 = vmatpush.bf16.msra.mxu3 %v1565_v57  ;;  %v468_v55 = vperm.slane %v2858_v41, 3 }
 0x180   :  { %1192 = vmatpush.bf16.msrb.mxu0 %v1345_v58  ;;  %1205 = vmatpush.bf16.msrb.mxu1 %v1569_v59 }
 0x182   :  { %1167 = vmatmul.bf16.vlgmr.msra.gmra.mxu2 %v2573_v1  ;;  %1180 = vmatmul.bf16.vlgmr.msra.gmra.mxu3 %v2575_v27 }
 0x183   :  { %1211 = vmatpush.bf16.msrb.mxu2 %v1545_v60  ;;  %1224 = vmatpush.bf16.msrb.mxu3 %v1769_v62  ;;  %v467_v62 = vperm.slane %v2858_v41, 2 }
 0x184   :  { %1193 = vmatmul.bf16.vlgmr.msrb.gmra.mxu0 %v2573_v1  ;;  %1206 = vmatmul.bf16.vlgmr.msrb.gmra.mxu1 %v2575_v27 }
 0x187   :  { %1212 = vmatpush.bf16.msrb.mxu2 %v1517_v5  ;;  %1225 = vmatpush.bf16.msrb.mxu3 %v1741_v6 }
 0x18b   :  { %1213 = vmatpush.bf16.msrb.mxu2 %v1489_v61  ;;  %1226 = vmatpush.bf16.msrb.mxu3 %v1713_v10  ;;  %v470_v61 = vperm.slane %v2858_v41, 5 }
 0x18f   :  { %1214 = vmatpush.bf16.msrb.mxu2 %v1461_v15  ;;  %1227 = vmatpush.bf16.msrb.mxu3 %v1685_v16 }
 0x193   :  { %1215 = vmatpush.bf16.msrb.mxu2 %v1433_v20  ;;  %1228 = vmatpush.bf16.msrb.mxu3 %v1657_v21 }
 0x197   :  { %1216 = vmatpush.bf16.msrb.mxu2 %v1405_v28  ;;  %1229 = vmatpush.bf16.msrb.mxu3 %v1629_v30 }
 0x19b   :  { %1217 = vmatpush.bf16.msrb.mxu2 %v1377_v34  ;;  %1230 = vmatpush.bf16.msrb.mxu3 %v1601_v35 }
 0x19f   :  { %1218 = vmatpush.bf16.msrb.mxu2 %v1349_v39  ;;  %1231 = vmatpush.bf16.msrb.mxu3 %v1573_v40 }
 0x1a2   :  { %1219 = vmatmul.bf16.vlgmr.msrb.gmra.mxu2 %v2573_v1  ;;  %1232 = vmatmul.bf16.vlgmr.msrb.gmra.mxu3 %v2575_v27 }
 0x1df   :  { %v1090_v43 = vpop.f32.mrf.mxu0  ;;  %v1103_v44 = vpop.f32.mrf.mxu1 }
 0x1e0   :  { %v1091_v45 = vadd.f32 %v1090_v43, %v466_v42 }
 0x1e2   :  { %v1104_v47 = vadd.f32 %v1103_v44, %v1091_v45 }
 0x1e4   :  { %1908 = vtanh.f32 %v1104_v47  ;;  %v1064_v48 = vpop.f32.mrf.mxu2  ;;  %v1077_v49 = vpop.f32.mrf.mxu3 }
 0x1e5   :  { %v1065_v50 = vadd.f32 %v1064_v48, %v465_v46 }
 0x1e7   :  { %v1078_v1 = vadd.f32 %v1077_v49, %v1065_v50  ;;  %v1092_v51 = vpop.f32.mrf.mxu0  ;;  %v1105_v27 = vpop.f32.mrf.mxu1 }
 0x1e9   :  { %1910 = vtanh.f32 %v1078_v1 }
 0x1ea   :  { %v1909_v52 = vpop.eup %1908 }
 0x1eb   :  { %1245 = vst [vmem:[%s2896_s8 + $0x8] sm:$0xff] %v1909_v52 }
 0x1ec   :  { %v1066_v53 = vpop.f32.mrf.mxu2  ;;  %v1079_v54 = vpop.f32.mrf.mxu3 }
 0x1ef   :  { %v1911_v57 = vpop.eup %1910  ;;  %v1142_v58 = vpop.f32.mrf.mxu0 }
 0x1f0   :  { %v1155_v59 = vpop.f32.mrf.mxu1  ;;  %1244 = vst [vmem:[%s2896_s8] sm:$0xff] %v1911_v57  ;;  %v1143_v60 = vadd.f32 %v1142_v58, %v468_v55 }
 0x1f2   :  { %v1156_v63 = vadd.f32 %v1155_v59, %v1143_v60 }
 0x1f4   :  { %1912 = vtanh.f32 %v1156_v63  ;;  %v1116_v2 = vpop.f32.mrf.mxu2  ;;  %v1129_v3 = vpop.f32.mrf.mxu3 }
 0x1f5   :  { %v1117_v4 = vadd.f32 %v1116_v2, %v467_v62 }
 0x1f7   :  { %v1130_v5 = vadd.f32 %v1129_v3, %v1117_v4  ;;  %v1144_v6 = vpop.f32.mrf.mxu0 }
 0x1f8   :  { %v1157_v7 = vpop.f32.mrf.mxu1 }
 0x1f9   :  { %1914 = vtanh.f32 %v1130_v5 }
 0x1fa   :  { %v1913_v8 = vpop.eup %1912 }
 0x1fb   :  { %1247 = vst [vmem:[%s2896_s8 + $0x18] sm:$0xff] %v1913_v8 }
 0x1fc   :  { %v1118_v56 = vpop.f32.mrf.mxu2  ;;  %v1131_v11 = vpop.f32.mrf.mxu3 }
 0x1ff   :  { %v1915_v10 = vpop.eup %1914 }
 0x200   :  { %1246 = vst [vmem:[%s2896_s8 + $0x10] sm:$0xff] %v1915_v10 }
 0x201   :  { %v1194_v12 = vpop.f32.mrf.mxu0  ;;  %v1207_v13 = vpop.f32.mrf.mxu1 }
 0x202   :  { %v1195_v0 = vadd.f32 %v1194_v12, %v470_v61 }
 0x204   :  { %v1208_v15 = vadd.f32 %v1207_v13, %v1195_v0 }
 0x205   :  { %v1168_v16 = vpop.f32.mrf.mxu2  ;;  %v1181_v9 = vpop.f32.mrf.mxu3 }
 0x206   :  { %1916 = vtanh.f32 %v1208_v15  ;;  %v1169_v17 = vadd.f32 %v1168_v16, %v469_v14 }
 0x208   :  { %v1182_v18 = vadd.f32 %v1181_v9, %v1169_v17 }
 0x209   :  { %v1196_v19 = vpop.f32.mrf.mxu0  ;;  %v1209_v20 = vpop.f32.mrf.mxu1 }
 0x20a   :  { %1918 = vtanh.f32 %v1182_v18 }
 0x20c   :  { %v1917_v21 = vpop.eup %1916 }
 0x20d   :  { %1249 = vst [vmem:[%s2896_s8 + $0x28] sm:$0xff] %v1917_v21  ;;  %v1170_v23 = vpop.f32.mrf.mxu2  ;;  %v1183_v24 = vpop.f32.mrf.mxu3 }
 0x210   :  { %v1919_v25 = vpop.eup %1918 }
 0x211   :  { %1248 = vst [vmem:[%s2896_s8 + $0x20] sm:$0xff] %v1919_v25 }
 0x225   :  { %v1220_v28 = vpop.f32.mrf.mxu2  ;;  %v1233_v30 = vpop.f32.mrf.mxu3 }
 0x226   :  { %v1221_v31 = vadd.f32 %v1220_v28, %v471_v26 }
 0x228   :  { %v1234_v32 = vadd.f32 %v1233_v30, %v1221_v31 }
 0x22a   :  { %1920 = vtanh.f32 %v1234_v32 }
 0x22d   :  { %v1222_v22 = vpop.f32.mrf.mxu2  ;;  %v1235_v33 = vpop.f32.mrf.mxu3 }
 0x230   :  { %v1921_v34 = vpop.eup %1920 }
 0x231   :  { %1250 = vst [vmem:[%s2896_s8 + $0x30] sm:$0xff] %v1921_v34 }

</bundles_post_ra>
